<compile_context>
chip_gen: v6e
topology: v6e:2x2x1
jax: 0.10.0
libtpu: 0.0.40
codegen_flags: <defaults>
</compile_context>

<pallas_src>
import functools
import math

import jax
import jax.numpy as jnp
from jax import lax
from jax.experimental import pallas as pl
from jax.experimental.pallas import tpu as pltpu


def _round_up(x, m):
    return ((x + m - 1) // m) * m


def _cdiv(a, b):
    return (a + b - 1) // b


def _pad2(x, rows, cols):
    return jnp.pad(x, ((0, rows - x.shape[0]), (0, cols - x.shape[1])))


# ---------------------------------------------------------------------------
# Kernel 1: dictionary projection  zz = dic_z @ wz.T + bz   (computed once)
# ---------------------------------------------------------------------------
def _project_zz_kernel(dz_ref, wzt_ref, bz_ref, zz_ref):
    dz = dz_ref[...].astype(jnp.bfloat16)
    zz = jnp.dot(dz, wzt_ref[...], preferred_element_type=jnp.float32)
    zz = zz + bz_ref[...]
    zz_ref[...] = zz.astype(zz_ref.dtype)


# ---------------------------------------------------------------------------
# Kernel 2: attention over the pre-projected dictionary, tiled over N
# ---------------------------------------------------------------------------
def _causal_t_kernel(t_ref, zz_ref, dz_ref, wyt_ref, by_ref, o_ref, *, m_real):
    # t_ref   : (tile_n, Ep) f32   query tile (pipelined over the N grid)
    # zz_ref  : (Mp, Ep)     bf16  wz(dic_z)          (resident, single-buffered)
    # dz_ref  : (Mp, Ep)     bf16  dic_z              (resident, single-buffered)
    # wyt_ref : (Ep, Ep)     bf16  wy.T * 1/sqrt(E)   (resident, single-buffered)
    # by_ref  : (1, Ep)      f32   by   * 1/sqrt(E)   (resident, single-buffered)
    t = t_ref[...].astype(jnp.bfloat16)

    # ty = (t @ wy.T + by) * 1/sqrt(E)   (the scale is folded into wyt/by)
    ty = jnp.dot(t, wyt_ref[...], preferred_element_type=jnp.float32) + by_ref[...]

    # logits = ty @ zz.T expressed as an rhs-transposed contraction so the MXU
    # consumes zz directly (no XLU transpose of the (Mp, Ep) resident).
    att = lax.dot_general(ty.astype(jnp.bfloat16), zz_ref[...],
                          (((1,), (1,)), ((), ())),
                          preferred_element_type=jnp.float32)      # (tile_n, Mp)

    # Mask the zero-padded dictionary columns so they get exactly 0 softmax mass.
    col = lax.broadcasted_iota(jnp.int32, att.shape, 1)
    att = jnp.where(col < m_real, att, jnp.float32(-1e30))

    # Softmax over the dictionary axis; elementwise math in f32 (v5e-safe).
    att = att - jnp.max(att, axis=1, keepdims=True)
    p = jnp.exp(att)
    p = p * pl.reciprocal(jnp.sum(p, axis=1, keepdims=True), approx=True)

    # causal_t = softmax @ dic_z  (padded dic_z rows carry exactly zero weight)
    o_ref[...] = jnp.dot(p.astype(jnp.bfloat16), dz_ref[...],
                         preferred_element_type=jnp.float32).astype(o_ref.dtype)


def causal_t_forward(t, sub_dic_z, rel_dic_z, obj_dic_z, wy, by, wz, bz,
                     *, max_tile_n=256):
    """JAX wrapper reproducing Causal_t.forward with Pallas TPU kernels."""
    N, E = t.shape
    # TODO(synk): at very large dictionary sizes, pass sub/rel/obj as separate
    # inputs (or DMA-concatenate into VMEM scratch) to avoid this extra HBM copy.
    dic_z = jnp.concatenate([sub_dic_z, rel_dic_z, obj_dic_z], axis=0)   # (M, E)
    M = dic_z.shape[0]

    # Lane-dense padding: embedding axis and dictionary axis to multiples of 128.
    Ep = _round_up(E, 128)
    Mp = _round_up(M, 128)

    # N tiling: multiples of 8 sublanes; aim for >= 2 grid steps when N allows so
    # the "parallel" axis can shard across both v7x TensorCores.
    ntiles = max(1, _cdiv(N, max_tile_n))
    if N > 8:
        ntiles = max(ntiles, 2)
    tile_n = _round_up(_cdiv(N, ntiles), 8)
    Np = _round_up(N, tile_n)

    scale = 1.0 / math.sqrt(float(E))
    out_dtype = t.dtype

    # Pre-transposed weights (PyTorch Linear: y = x @ W.T + b); attention scale
    # folded into wy/by; MXU operands stored in bf16, biases stay f32.
    wyt = _pad2(jnp.transpose(wy) * scale, Ep, Ep).astype(jnp.bfloat16)
    byp = _pad2(by.reshape(1, E) * scale, 1, Ep).astype(jnp.float32)
    wzt = _pad2(jnp.transpose(wz), Ep, Ep).astype(jnp.bfloat16)
    bzp = _pad2(bz.reshape(1, E), 1, Ep).astype(jnp.float32)

    t_p = _pad2(t, Np, Ep).astype(jnp.float32)
    dz_f32 = _pad2(dic_z, Mp, Ep).astype(jnp.float32)
    dz_b16 = dz_f32.astype(jnp.bfloat16)

    vmem_limit = 64 * 1024 * 1024  # raise the scoped default; valid on v5e/v6e/v7x

    # ---- 1) zz = dic_z @ wz.T + bz, computed once (hoisted out of the N grid) ----
    tile_m = 256 if Mp % 256 == 0 else 128
    zz = pl.pallas_call(
        _project_zz_kernel,
        out_shape=jax.ShapeDtypeStruct((Mp, Ep), jnp.bfloat16),
        grid=(Mp // tile_m,),
        in_specs=[
            pl.BlockSpec((tile_m, Ep), lambda i: (i, 0)),
            pl.BlockSpec((Ep, Ep), lambda i: (0, 0), pipeline_mode=pl.Buffered(1)),
            pl.BlockSpec((1, Ep), lambda i: (0, 0), pipeline_mode=pl.Buffered(1)),
        ],
        out_specs=pl.BlockSpec((tile_m, Ep), lambda i: (i, 0)),
        compiler_params=pltpu.CompilerParams(
            dimension_semantics=("parallel",),
            vmem_limit_bytes=vmem_limit),
        cost_estimate=pl.CostEstimate(
            flops=2 * Mp * Ep * Ep,
            transcendentals=0,
            bytes_accessed=Mp * Ep * 4 + Ep * Ep * 2 + Ep * 4 + Mp * Ep * 2),
    )(dz_f32, wzt, bzp)

    # ---- 2) attention kernel, tiled over the query axis -------------------------
    # TODO(synk): when the bf16 residents (zz + dic_z ~= 4*Mp*Ep bytes) approach
    # ~32 MiB, switch to a second "arbitrary" grid axis over Mp with an
    # online-softmax (m, l, acc) VMEM scratch so the dictionary streams from HBM.
    resident = lambda shape: pl.BlockSpec(shape, lambda i: (0, 0),
                                          pipeline_mode=pl.Buffered(1))

    out = pl.pallas_call(
        functools.partial(_causal_t_kernel, m_real=M),
        out_shape=jax.ShapeDtypeStruct((Np, Ep), out_dtype),
        grid=(Np // tile_n,),
        in_specs=[
            pl.BlockSpec((tile_n, Ep), lambda i: (i, 0)),   # t (tiled over N)
            resident((Mp, Ep)),                             # zz    (bf16)
            resident((Mp, Ep)),                             # dic_z (bf16)
            resident((Ep, Ep)),                             # wy.T  (bf16, pre-scaled)
            resident((1, Ep)),                              # by    (f32,  pre-scaled)
        ],
        out_specs=pl.BlockSpec((tile_n, Ep), lambda i: (i, 0)),
        compiler_params=pltpu.CompilerParams(
            dimension_semantics=("parallel",),
            vmem_limit_bytes=vmem_limit),
        cost_estimate=pl.CostEstimate(
            flops=2 * Np * Ep * Ep + 4 * Np * Mp * Ep,
            transcendentals=Np * Mp,
            bytes_accessed=(Np * Ep * 4 + 2 * Mp * Ep * 2 + Ep * Ep * 2
                            + Ep * 4 + Np * Ep * 4)),
    )(t_p, zz, dz_b16, wyt, byp)

    if Np == N and Ep == E:
        return out
    return out[:N, :E]


def reference_forward(t, sub_dic_z, rel_dic_z, obj_dic_z, wy, by, wz, bz):
    """Pure-JAX f32 reference (mirrors the PyTorch code)."""
    E = t.shape[-1]
    dic_z = jnp.concatenate([sub_dic_z, rel_dic_z, obj_dic_z], axis=0)
    ty = t @ wy.T + by
    zz = dic_z @ wz.T + bz
    att = (ty @ zz.T) / math.sqrt(E)
    att = jax.nn.softmax(att, axis=1)
    return att @ dic_z


if __name__ == "__main__":
    key = jax.random.PRNGKey(0)
    embedding_size = 32   # divisible by num_heads=8 (head_dim unused in forward)
    n_t = 8               # number of query rows in t
    n_sub, n_rel, n_obj = 8, 8, 8

    k1, k2, k3, k4, k5, k6 = jax.random.split(key, 6)

    # Deterministic parameter init mirroring nn.init.normal_(std=0.02) / constant_(0)
    wy = 0.02 * jax.random.normal(k1, (embedding_size, embedding_size), jnp.float32)
    wz = 0.02 * jax.random.normal(k2, (embedding_size, embedding_size), jnp.float32)
    by = jnp.zeros((embedding_size,), jnp.float32)
    bz = jnp.zeros((embedding_size,), jnp.float32)

    t = jax.random.normal(k3, (n_t, embedding_size), jnp.float32)
    sub_dic_z = jax.random.normal(k4, (n_sub, embedding_size), jnp.float32)
    rel_dic_z = jax.random.normal(k5, (n_rel, embedding_size), jnp.float32)
    obj_dic_z = jax.random.normal(k6, (n_obj, embedding_size), jnp.float32)

    out = causal_t_forward(t, sub_dic_z, rel_dic_z, obj_dic_z, wy, by, wz, bz)
    out = jax.block_until_ready(out)

    ref = reference_forward(t, sub_dic_z, rel_dic_z, obj_dic_z, wy, by, wz, bz)
    assert out.shape == (n_t, embedding_size)
    # Tolerance accounts for bf16 MXU operands (f32 accumulation) and the approx
    # (EUP) reciprocal in the softmax denominator.
    assert jnp.allclose(out, ref, atol=2e-2, rtol=2e-2), "mismatch vs reference"

    print("KERNEL_OK")
</pallas_src>

<mosaic_0001>
module attributes {stable_mosaic.version = 11 : i64} {
  func.func @_project_zz_kernel(%arg0: i32, %arg1: memref<128x128xf32, #tpu.memory_space<vmem>>, %arg2: memref<128x128xbf16, #tpu.memory_space<vmem>>, %arg3: memref<1x128xf32, #tpu.memory_space<vmem>>, %arg4: memref<128x128xbf16, #tpu.memory_space<vmem>>) attributes {dimension_semantics = [#tpu.dimension_semantics<parallel>], iteration_bounds = array<i64: 1>, scalar_prefetch = 0 : i64, scratch_operands = 0 : i64, tpu.core_type = #tpu.core_type<tc>, window_params = [{transform_indices = @transform_0, window_bounds = array<i64: 128, 128>}, {pipeline_mode = #tpu.pipeline_mode<synchronous>, transform_indices = @transform_1, window_bounds = array<i64: 128, 128>}, {pipeline_mode = #tpu.pipeline_mode<synchronous>, transform_indices = @transform_2, window_bounds = array<i64: 1, 128>}, {transform_indices = @transform_3, window_bounds = array<i64: 128, 128>}]} {
    %c0 = arith.constant 0 : index
    %c0_0 = arith.constant 0 : index
    %0 = vector.load %arg1[%c0, %c0_0] : memref<128x128xf32, #tpu.memory_space<vmem>>, vector<128x128xf32>
    %1 = arith.truncf %0 : vector<128x128xf32> to vector<128x128xbf16>
    %c0_1 = arith.constant 0 : index
    %c0_2 = arith.constant 0 : index
    %2 = vector.load %arg2[%c0_1, %c0_2] : memref<128x128xbf16, #tpu.memory_space<vmem>>, vector<128x128xbf16>
    %cst = arith.constant dense<0.000000e+00> : vector<128x128xf32>
    %3 = tpu.matmul %1, %2, %cst {dimension_numbers = #tpu.dot_dimension_numbers<[1], [0], [0], [1], [0, 0, 1, 1], [], []>} : vector<128x128xbf16>, vector<128x128xbf16>, vector<128x128xf32> -> vector<128x128xf32>
    %c0_3 = arith.constant 0 : index
    %c0_4 = arith.constant 0 : index
    %4 = vector.load %arg3[%c0_3, %c0_4] : memref<1x128xf32, #tpu.memory_space<vmem>>, vector<1x128xf32>
    %5 = vector.broadcast %4 : vector<1x128xf32> to vector<128x128xf32>
    %6 = arith.addf %3, %5 : vector<128x128xf32>
    %7 = arith.truncf %6 : vector<128x128xf32> to vector<128x128xbf16>
    %c0_5 = arith.constant 0 : index
    %c0_6 = arith.constant 0 : index
    %8 = vector.load %arg4[%c0_5, %c0_6] : memref<128x128xbf16, #tpu.memory_space<vmem>>, vector<128x128xbf16>
    tpu.vector_store %arg4[%c0_5, %c0_6], %7 {strides = array<i32>} : memref<128x128xbf16, #tpu.memory_space<vmem>>, vector<128x128xbf16>,
    return
  }
  func.func @transform_0(%arg0: i32) -> (i32, i32) {
    %c0_i32 = arith.constant 0 : i32
    %c0_i32_0 = arith.constant 0 : i32
    return %arg0, %c0_i32 : i32, i32
  }
  func.func @transform_1(%arg0: i32) -> (i32, i32) {
    %c0_i32 = arith.constant 0 : i32
    %c0_i32_0 = arith.constant 0 : i32
    %c0_i32_1 = arith.constant 0 : i32
    return %c0_i32, %c0_i32_0 : i32, i32
  }
  func.func @transform_2(%arg0: i32) -> (i32, i32) {
    %c0_i32 = arith.constant 0 : i32
    %c0_i32_0 = arith.constant 0 : i32
    %c0_i32_1 = arith.constant 0 : i32
    return %c0_i32, %c0_i32_0 : i32, i32
  }
  func.func @transform_3(%arg0: i32) -> (i32, i32) {
    %c0_i32 = arith.constant 0 : i32
    %c0_i32_0 = arith.constant 0 : i32
    return %arg0, %c0_i32 : i32, i32
  }
}

</mosaic_0001>

<bundles_post_ra>
// kernel: tpu_custom_call.1
= control target key start
LH: loop header
LB: loop body
LE: loop exit
PB: predicated region body
PF: predicated region fallthrough
CT: control target
= control target key end

     0   :  { %8 = vsyncpa [#allocation3], 0  ;;  %s612_s0 = inlined_call_operand.hbm [shape: f32[128,128], index: 0, kind: input, shape index: {}]   ;;  %s613_s1 = inlined_call_operand.hbm [shape: bf16[128,128], index: 1, kind: input, shape index: {}]   ;;  %s614_s2 = inlined_call_operand.vmem [shape: f32[1,128], index: 2, kind: input, shape index: {}]   ;;  %s615_s3 = inlined_call_operand.hbm [shape: bf16[128,128], index: 3, kind: output, shape index: {}]  }
   0x1   :  { %9 = vsyncpa [#allocation6], 0 }
   0x2   :  { %10 = vsyncpa [#allocation4], 0  ;;  %s567_s12 = smov [#allocation2]  }
   0x3   :  { %s16_s13 = sshll.u32 %s567_s12, 4  ;;  %s17_s13 = int_to_ptr.vmem [resolvable:$true] %s16_s13 }
   0x4   :  { %s509_s14 = scalar_lea.vmem %s17_s13, 2048  ;;  %p514_p1 = scmp.lt.s32.totalorder %s17_s13, %s17_s13 }
   0x5   :  { %p510_p0 = scmp.ne.s32.totalorder %s17_s13, %s509_s14  ;;  %p515_p2 = scmp.lt.s32.totalorder %s509_s14, %s509_s14 }
   0x7   :  { %p516_p3 = por %p515_p2, %p514_p1 }
   0x9   :  { %p517_p4 = pnand %p516_p3, %p510_p0 }
   0xb   :  { %520 = shalt.err (!%p517_p4)
}
   0xc   :  { %s568_s15 = smov 128   ;;  %s569_s16 = smov 8  }
   0xd   :  { %22 = dma.hbm_to_vmem [thread:$0]  %s612_s0, 2048, %s17_s13, [#allocation3], %s568_s15, %s568_s15, %s569_s16  }
   0xe   :  { %s570_s19 = smov [#allocation5]  }
   0xf   :  { %s28_s20 = sshll.u32 %s570_s19, 4  ;;  %s29_s20 = int_to_ptr.vmem [resolvable:$true] %s28_s20 }
  0x10   :  { %s529_s21 = scalar_lea.vmem %s29_s20, 1024  ;;  %p534_p6 = scmp.lt.s32.totalorder %s29_s20, %s29_s20 }
  0x11   :  { %p530_p5 = scmp.ne.s32.totalorder %s29_s20, %s529_s21  ;;  %p535_p7 = scmp.lt.s32.totalorder %s529_s21, %s529_s21 }
  0x13   :  { %p536_p8 = por %p535_p7, %p534_p6 }
  0x15   :  { %p537_p9 = pnand %p536_p8, %p530_p5 }
  0x17   :  { %540 = shalt.err (!%p537_p9)
}
  0x18   :  { %s571_s22 = smov 64   ;;  %s572_s23 = smov 4  }
  0x19   :  { %34 = dma.hbm_to_vmem [thread:$0]  %s613_s1, 1024, %s29_s20, [#allocation6], %s571_s22, %s571_s22, %s572_s23  }
  0x1a   :  { %561 = dma.done.wait [#allocation3], 2048  }
  0x1b   :  { %562 = vsyncadd [#allocation3], 4294965248 }
  0x1c   :  { %563 = dma.done.wait [#allocation6], 1024  }
  0x1d   :  { %564 = vsyncadd [#allocation6], 4294966272  ;;  %v493_v0 = vld [vmem:[#allocation5 + $0x38] sm:$0xff]   ;;  %v494_v1 = vld [vmem:[#allocation5 + $0x30] sm:$0xff]  }
  0x1e   :  { %438 = vmatprep.subr.bf16.mxu0 %v493_v0  ;;  %470 = vmatprep.subr.bf16.mxu1 %v493_v0  ;;  %v495_v2 = vld [vmem:[#allocation5 + $0x28] sm:$0xff]   ;;  %v496_v3 = vld [vmem:[#allocation5 + $0x20] sm:$0xff]   ;;  %v497_v10 = vld [vmem:[#allocation5 + $0x18] sm:$0xff]  }
  0x1f   :  { %439 = vmatpush3.bf16.msra.mxu0 %v493_v0  ;;  %478 = vmatpush3.bf16.msra.mxu1 %v493_v0  ;;  %v44_v4 = vld [vmem:[#allocation2] sm:$0xff]  ;;  %v45_v5 = vld [vmem:[#allocation2 + $0x8] sm:$0xff]  ;;  %v498_v11 = vld [vmem:[#allocation5 + $0x10] sm:$0xff]  }
  0x20   :  { %440 = vmatprep.subr.bf16.mxu0 %v494_v1  ;;  %471 = vmatprep.subr.bf16.mxu1 %v494_v1  ;;  %v52_v6 = vld [vmem:[#allocation2 + $0x40] sm:$0xff]  ;;  %v60_v7 = vpack.c.bf16 %v45_v5, %v44_v4  ;;  %v53_v8 = vld [vmem:[#allocation2 + $0x48] sm:$0xff]  ;;  %v46_v14 = vld [vmem:[#allocation2 + $0x10] sm:$0xff] }
  0x21   :  { %v64_v9 = vpack.c.bf16 %v53_v8, %v52_v6  ;;  %v499_v12 = vld [vmem:[#allocation5 + $0x8] sm:$0xff]   ;;  %v500_v13 = vld [vmem:[#allocation5] sm:$0xff]   ;;  %v47_v15 = vld [vmem:[#allocation2 + $0x18] sm:$0xff] }
  0x22   :  { %454 = vmatprep.mubr.bf16.mxu0 %v60_v7  ;;  %v54_v16 = vld [vmem:[#allocation2 + $0x50] sm:$0xff]  ;;  %v55_v17 = vld [vmem:[#allocation2 + $0x58] sm:$0xff]  ;;  %v48_v18 = vld [vmem:[#allocation2 + $0x20] sm:$0xff]  ;;  %v61_v22 = vpack.c.bf16 %v47_v15, %v46_v14 }
  0x23   :  { %441 = vmatpush3.bf16.msra.mxu0 %v494_v1  ;;  %479 = vmatpush3.bf16.msra.mxu1 %v494_v1  ;;  %v49_v19 = vld [vmem:[#allocation2 + $0x28] sm:$0xff]  ;;  %v56_v20 = vld [vmem:[#allocation2 + $0x60] sm:$0xff]  ;;  %v65_v23 = vpack.c.bf16 %v55_v17, %v54_v16  ;;  %v50_v26 = vld [vmem:[#allocation2 + $0x30] sm:$0xff] }
  0x24   :  { %442 = vmatprep.subr.bf16.mxu0 %v495_v2  ;;  %472 = vmatprep.subr.bf16.mxu1 %v495_v2  ;;  %v57_v21 = vld [vmem:[#allocation2 + $0x68] sm:$0xff]  ;;  %v62_v24 = vpack.c.bf16 %v49_v19, %v48_v18  ;;  %v51_v27 = vld [vmem:[#allocation2 + $0x38] sm:$0xff]  ;;  %v58_v28 = vld [vmem:[#allocation2 + $0x70] sm:$0xff] }
  0x25   :  { %462 = vmatprep.mubr.bf16.mxu1 %v64_v9  ;;  %v66_v25 = vpack.c.bf16 %v57_v21, %v56_v20  ;;  %v59_v29 = vld [vmem:[#allocation2 + $0x78] sm:$0xff]  ;;  %v63_v30 = vpack.c.bf16 %v51_v27, %v50_v26  ;;  %v334_v34 = vld [vmem:[%s614_s2] ss:$0 sm:$0xff]  ;;  %s573_s2 = smov [#allocation7]  }
  0x26   :  { %v67_v31 = vpack.c.bf16 %v59_v29, %v58_v28  ;;  %s321_s26 = sshll.u32 %s573_s2, 4  ;;  %s322_s26 = int_to_ptr.vmem [resolvable:$true] %s321_s26 }
  0x27   :  { %443 = vmatpush3.bf16.msra.mxu0 %v495_v2  ;;  %480 = vmatpush3.bf16.msra.mxu1 %v495_v2  ;;  %s541_s27 = scalar_lea.vmem %s322_s26, 1024  ;;  %p546_p11 = scmp.lt.s32.totalorder %s322_s26, %s322_s26 }
  0x28   :  { %444 = vmatprep.subr.bf16.mxu0 %v496_v3  ;;  %473 = vmatprep.subr.bf16.mxu1 %v496_v3  ;;  %p542_p10 = scmp.ne.s32.totalorder %s322_s26, %s541_s27  ;;  %p547_p12 = scmp.lt.s32.totalorder %s541_s27, %s541_s27 }
  0x2a   :  { %p548_p13 = por %p547_p12, %p546_p11 }
  0x2b   :  { %445 = vmatpush3.bf16.msra.mxu0 %v496_v3  ;;  %481 = vmatpush3.bf16.msra.mxu1 %v496_v3 }
  0x2c   :  { %446 = vmatprep.subr.bf16.mxu0 %v497_v10  ;;  %474 = vmatprep.subr.bf16.mxu1 %v497_v10  ;;  %p549_p0 = pnand %p548_p13, %p542_p10 }
  0x2f   :  { %447 = vmatpush3.bf16.msra.mxu0 %v497_v10  ;;  %482 = vmatpush3.bf16.msra.mxu1 %v497_v10 }
  0x30   :  { %448 = vmatprep.subr.bf16.mxu0 %v498_v11  ;;  %475 = vmatprep.subr.bf16.mxu1 %v498_v11 }
  0x33   :  { %449 = vmatpush3.bf16.msra.mxu0 %v498_v11  ;;  %483 = vmatpush3.bf16.msra.mxu1 %v498_v11 }
  0x34   :  { %450 = vmatprep.subr.bf16.mxu0 %v499_v12  ;;  %476 = vmatprep.subr.bf16.mxu1 %v499_v12 }
  0x37   :  { %451 = vmatpush3.bf16.msra.mxu0 %v499_v12  ;;  %484 = vmatpush3.bf16.msra.mxu1 %v499_v12 }
  0x38   :  { %452 = vmatprep.subr.bf16.mxu0 %v500_v13  ;;  %477 = vmatprep.subr.bf16.mxu1 %v500_v13 }
  0x3b   :  { %453 = vmatpush3.bf16.msra.mxu0 %v500_v13  ;;  %485 = vmatpush3.bf16.msra.mxu1 %v500_v13 }
  0x3e   :  { %455 = vmatmul.mubr.bf16.vlgmr.msra.gmra.mxu0 %v61_v22  ;;  %463 = vmatmul.mubr.bf16.vlgmr.msra.gmra.mxu1 %v65_v23 }
  0x3f   :  { %458 = vmatprep.mubr.bf16.mxu0 %v62_v24  ;;  %466 = vmatprep.mubr.bf16.mxu1 %v66_v25 }
  0x46   :  { %459 = vmatmul.mubr.bf16.gmra.mxu0 %v63_v30  ;;  %467 = vmatmul.mubr.bf16.gmra.mxu1 %v67_v31 }
  0xfe   :  { %v456_v32 = vpop.f32.mrf.mxu0  ;;  %v464_v33 = vpop.f32.mrf.mxu1 }
  0xff   :  { %v182_v39 = vadd.f32 %v456_v32, %v334_v34  ;;  %v214_v40 = vadd.f32 %v464_v33, %v334_v34 }
 0x100   :  { %v173_v35 = vpop.f32.mrf.mxu0  ;;  %v205_v36 = vpop.f32.mrf.mxu1 }
 0x101   :  { %v174_v43 = vadd.f32 %v334_v34, %v173_v35  ;;  %v206_v44 = vadd.f32 %v334_v34, %v205_v36 }
 0x102   :  { %v457_v37 = vpop.f32.mrf.mxu0  ;;  %v465_v38 = vpop.f32.mrf.mxu1 }
 0x103   :  { %v185_v41 = vadd.f32 %v457_v37, %v334_v34  ;;  %v217_v42 = vadd.f32 %v465_v38, %v334_v34 }
 0x104   :  { %v176_v45 = vpop.f32.mrf.mxu0  ;;  %v208_v46 = vpop.f32.mrf.mxu1 }
 0x105   :  { %v383_v47 = vpack.c.bf16 %v185_v41, %v182_v39  ;;  %v403_v48 = vpack.c.bf16 %v217_v42, %v214_v40  ;;  %v177_v49 = vadd.f32 %v334_v34, %v176_v45  ;;  %v209_v50 = vadd.f32 %v334_v34, %v208_v46 }
 0x106   :  { %v460_v51 = vpop.f32.mrf.mxu0  ;;  %v468_v52 = vpop.f32.mrf.mxu1 }
 0x107   :  { %415 = vst [vmem:[#allocation7 + $0x8] sm:$0xff] %v383_v47   ;;  %419 = vst [vmem:[#allocation7 + $0x28] sm:$0xff] %v403_v48   ;;  %v378_v53 = vpack.c.bf16 %v177_v49, %v174_v43  ;;  %v398_v54 = vpack.c.bf16 %v209_v50, %v206_v44  ;;  %v198_v59 = vadd.f32 %v460_v51, %v334_v34 }
 0x108   :  { %v189_v55 = vpop.f32.mrf.mxu0  ;;  %v221_v56 = vpop.f32.mrf.mxu1  ;;  %v230_v60 = vadd.f32 %v468_v52, %v334_v34 }
 0x109   :  { %379 = vst [vmem:[#allocation7] sm:$0xff] %v378_v53   ;;  %418 = vst [vmem:[#allocation7 + $0x20] sm:$0xff] %v398_v54   ;;  %v190_v63 = vadd.f32 %v334_v34, %v189_v55  ;;  %v222_v0 = vadd.f32 %v334_v34, %v221_v56 }
 0x10a   :  { %v461_v57 = vpop.f32.mrf.mxu0  ;;  %v469_v58 = vpop.f32.mrf.mxu1 }
 0x10b   :  { %v201_v61 = vadd.f32 %v461_v57, %v334_v34  ;;  %v233_v62 = vadd.f32 %v469_v58, %v334_v34 }
 0x10c   :  { %v192_v1 = vpop.f32.mrf.mxu0  ;;  %v224_v2 = vpop.f32.mrf.mxu1 }
 0x10d   :  { %v393_v3 = vpack.c.bf16 %v201_v61, %v198_v59  ;;  %v413_v4 = vpack.c.bf16 %v233_v62, %v230_v60  ;;  %v193_v5 = vadd.f32 %v334_v34, %v192_v1  ;;  %v225_v6 = vadd.f32 %v334_v34, %v224_v2 }
 0x10f   :  { %417 = vst [vmem:[#allocation7 + $0x18] sm:$0xff] %v393_v3   ;;  %421 = vst [vmem:[#allocation7 + $0x38] sm:$0xff] %v413_v4   ;;  %v388_v7 = vpack.c.bf16 %v193_v5, %v190_v63  ;;  %v408_v8 = vpack.c.bf16 %v225_v6, %v222_v0 }
 0x111   :  { %416 = vst [vmem:[#allocation7 + $0x10] sm:$0xff] %v388_v7   ;;  %420 = vst [vmem:[#allocation7 + $0x30] sm:$0xff] %v408_v8  }
 0x112   :  { %552 = shalt.err (!%p549_p0)
}
 0x113   :  { %327 = dma.vmem_to_hbm [thread:$0]  %s322_s26, 1024, %s615_s3, [#allocation4], %s571_s22, %s571_s22, %s572_s23  }
 0x114   :  { %565 = dma.done.wait [#allocation4], 1024  }
 0x115   :  { %566 = vsyncadd [#allocation4], 4294966272 }
 0x116   :  { %331 = vsyncpa [#allocation3], 1 }
 0x117   :  { %332 = vsyncpa [#allocation6], 1 }
 0x118   :  { %333 = vsyncpa [#allocation4], 1 }

</bundles_post_ra>
